<compile_context>
chip_gen: v7x
topology: tpu7x:2x2x1
jax: 0.10.0
libtpu: 0.0.40
codegen_flags: <defaults>
</compile_context>

<pallas_src>
import math
import jax
import jax.numpy as jnp
from jax import lax
from jax.experimental import pallas as pl
from jax.experimental.pallas import tpu as pltpu


def _lstm_kernel(xg_ref, w_hhT_ref, h0_ref, c0_ref, out_ref, hn_ref, cn_ref):
    """Recurrent part of the LSTM.

    xg_ref   : (S, B, 4H)  precomputed  x_t @ W_ih^T + b   (gate order i,f,o,g)
    w_hhT_ref: (H, 4H)     recurrent weight, pre-transposed (lane-dense)
    h0_ref   : (B, H)
    c0_ref   : (B, H)
    out_ref  : (S, B, H)
    hn_ref   : (B, H)
    cn_ref   : (B, H)
    """
    S = xg_ref.shape[0]
    H = h0_ref.shape[-1]

    # Load the recurrent weight once; it stays resident for the whole loop.
    w_hhT = w_hhT_ref[...]                                  # (H, 4H)

    def step(t, carry):
        h, c = carry
        gates = xg_ref[t] + jnp.dot(h, w_hhT,
                                    preferred_element_type=jnp.float32)  # (B, 4H)
        # Gate order after wrapper-side reorder: [i | f | o | g]
        sig = jax.nn.sigmoid(gates[:, :3 * H])              # one EUP pass, 3H lanes
        g = jnp.tanh(gates[:, 3 * H:])                      # one EUP pass, H lanes
        i_g = sig[:, 0 * H:1 * H]
        f_g = sig[:, 1 * H:2 * H]
        o_g = sig[:, 2 * H:3 * H]
        c_new = f_g * c + i_g * g
        h_new = o_g * jnp.tanh(c_new)
        out_ref[t] = h_new
        return (h_new, c_new)

    h_fin, c_fin = lax.fori_loop(0, S, step,
                                 (h0_ref[...], c0_ref[...]), unroll=True)
    # Final states written exactly once.
    hn_ref[...] = h_fin
    cn_ref[...] = c_fin


def cell_forward(inputs, hidden, w_ih, w_hh, b_ih, b_hh):
    """LSTM forward matching PyTorch Cell.forward(inputs, hidden)."""
    S, B, I = inputs.shape
    H4 = w_ih.shape[0]
    H = H4 // 4
    h0, c0 = hidden
    f32 = jnp.float32

    # Reorder PyTorch gate blocks (i, f, g, o) -> (i, f, o, g) so the kernel
    # can apply a single contiguous sigmoid / tanh.
    def _reorder(p):
        i, f, g, o = jnp.split(p, 4, axis=0)
        return jnp.concatenate([i, f, o, g], axis=0)

    w_ihT = _reorder(w_ih.astype(f32)).T                      # (I, 4H)
    w_hhT = _reorder(w_hh.astype(f32)).T                      # (H, 4H)
    bias = _reorder((b_ih + b_hh).astype(f32))                # (4H,)

    # Hoist the non-recurrent input projection out of the time loop:
    # one (S*B, I) @ (I, 4H) matmul for every timestep at once.
    x_proj = (inputs.astype(f32).reshape(S * B, I) @ w_ihT + bias)
    x_proj = x_proj.reshape(S, B, H4)                         # (S, B, 4H), lane-dense

    vmem = pl.BlockSpec(memory_space=pltpu.MemorySpace.VMEM)

    out, h_n, c_n = pl.pallas_call(
        _lstm_kernel,
        out_shape=(
            jax.ShapeDtypeStruct((S, B, H), f32),   # output
            jax.ShapeDtypeStruct((B, H), f32),      # h_n
            jax.ShapeDtypeStruct((B, H), f32),      # c_n
        ),
        in_specs=[vmem, vmem, vmem, vmem],
        out_specs=(vmem, vmem, vmem),
    )(x_proj, w_hhT, h0[0].astype(f32), c0[0].astype(f32))

    return out, (h_n[None], c_n[None])


def _lstm_reference(inputs, hidden, w_ih, w_hh, b_ih, b_hh):
    """Pure-JAX reference (same math as torch.nn.LSTM, original gate order)."""
    h0, c0 = hidden
    H = h0.shape[-1]

    def step(carry, x_t):
        h, c = carry
        gates = x_t @ w_ih.T + h @ w_hh.T + b_ih + b_hh
        i = jax.nn.sigmoid(gates[:, 0 * H:1 * H])
        f = jax.nn.sigmoid(gates[:, 1 * H:2 * H])
        g = jnp.tanh(gates[:, 2 * H:3 * H])
        o = jax.nn.sigmoid(gates[:, 3 * H:4 * H])
        c_new = f * c + i * g
        h_new = o * jnp.tanh(c_new)
        return (h_new, c_new), h_new

    (h_n, c_n), out = lax.scan(step, (h0[0], c0[0]), inputs)
    return out, (h_n[None], c_n[None])


if __name__ == "__main__":
    # Cell('lstm', input_size=16, output_size=32), train_init=False
    SEQ, BATCH, INPUT, HIDDEN = 8, 4, 16, 32
    key = jax.random.PRNGKey(0)
    k_x, k_wih, k_whh, k_bih, k_bhh = jax.random.split(key, 5)

    # Same init scheme as torch.nn.LSTM: U(-stdv, stdv)
    stdv = 1.0 / math.sqrt(HIDDEN)
    w_ih = jax.random.uniform(k_wih, (4 * HIDDEN, INPUT), jnp.float32, -stdv, stdv)
    w_hh = jax.random.uniform(k_whh, (4 * HIDDEN, HIDDEN), jnp.float32, -stdv, stdv)
    b_ih = jax.random.uniform(k_bih, (4 * HIDDEN,), jnp.float32, -stdv, stdv)
    b_hh = jax.random.uniform(k_bhh, (4 * HIDDEN,), jnp.float32, -stdv, stdv)

    inputs = jax.random.normal(k_x, (SEQ, BATCH, INPUT), jnp.float32)

    # train_init=False -> Cell.hidden_state(bs) gives zero h0 / c0
    h0 = jnp.zeros((1, BATCH, HIDDEN), jnp.float32)
    c0 = jnp.zeros((1, BATCH, HIDDEN), jnp.float32)

    out, (h_n, c_n) = cell_forward(inputs, (h0, c0), w_ih, w_hh, b_ih, b_hh)
    jax.block_until_ready((out, h_n, c_n))

    # Correctness check against pure-JAX reference
    out_ref, (h_ref, c_ref) = _lstm_reference(inputs, (h0, c0), w_ih, w_hh, b_ih, b_hh)
    assert jnp.allclose(out, out_ref, atol=1e-5), "output mismatch"
    assert jnp.allclose(h_n, h_ref, atol=1e-5), "h_n mismatch"
    assert jnp.allclose(c_n, c_ref, atol=1e-5), "c_n mismatch"

    print("KERNEL_OK")
</pallas_src>

<mosaic_0001>
module attributes {stable_mosaic.version = 11 : i64} {
  func.func @_lstm_kernel(%arg0: memref<8x4x128xf32, #tpu.memory_space<vmem>>, %arg1: memref<32x128xf32, #tpu.memory_space<vmem>>, %arg2: memref<4x32xf32, #tpu.memory_space<vmem>>, %arg3: memref<4x32xf32, #tpu.memory_space<vmem>>, %arg4: memref<8x4x32xf32, #tpu.memory_space<vmem>>, %arg5: memref<4x32xf32, #tpu.memory_space<vmem>>, %arg6: memref<4x32xf32, #tpu.memory_space<vmem>>) attributes {dimension_semantics = [], scalar_prefetch = 0 : i64, scratch_operands = 0 : i64, tpu.core_type = #tpu.core_type<tc>} {
    %c0 = arith.constant 0 : index
    %c0_0 = arith.constant 0 : index
    %0 = vector.load %arg1[%c0, %c0_0] : memref<32x128xf32, #tpu.memory_space<vmem>>, vector<32x128xf32>
    %c0_1 = arith.constant 0 : index
    %c0_2 = arith.constant 0 : index
    %1 = vector.load %arg2[%c0_1, %c0_2] : memref<4x32xf32, #tpu.memory_space<vmem>>, vector<4x32xf32>
    %c0_3 = arith.constant 0 : index
    %c0_4 = arith.constant 0 : index
    %2 = vector.load %arg3[%c0_3, %c0_4] : memref<4x32xf32, #tpu.memory_space<vmem>>, vector<4x32xf32>
    %c0_i32 = arith.constant 0 : i32
    %3 = arith.index_cast %c0_i32 : i32 to index
    %c0_5 = arith.constant 0 : index
    %c0_6 = arith.constant 0 : index
    %4 = vector.load %arg0[%3, %c0_5, %c0_6] : memref<8x4x128xf32, #tpu.memory_space<vmem>>, vector<1x4x128xf32>
    %5 = vector.shape_cast %4 : vector<1x4x128xf32> to vector<4x128xf32>
    %cst = arith.constant dense<0.000000e+00> : vector<4x128xf32>
    %6 = tpu.matmul %1, %0, %cst {dimension_numbers = #tpu.dot_dimension_numbers<[1], [0], [0], [1], [0, 0, 1, 1], [], []>} : vector<4x32xf32>, vector<32x128xf32>, vector<4x128xf32> -> vector<4x128xf32>
    %7 = arith.addf %5, %6 : vector<4x128xf32>
    %8 = vector.extract_strided_slice %7 {offsets = [0, 0], sizes = [4, 96], strides = [1, 1]} : vector<4x128xf32> to vector<4x96xf32>
    %9 = arith.negf %8 : vector<4x96xf32>
    %10 = math.exp %9 : vector<4x96xf32>
    %cst_7 = arith.constant 1.000000e+00 : f32
    %11 = vector.broadcast %cst_7 : f32 to vector<4x96xf32>
    %12 = arith.addf %11, %10 : vector<4x96xf32>
    %13 = arith.divf %11, %12 : vector<4x96xf32>
    %14 = vector.extract_strided_slice %7 {offsets = [0, 96], sizes = [4, 32], strides = [1, 1]} : vector<4x128xf32> to vector<4x32xf32>
    %15 = math.tanh %14 : vector<4x32xf32>
    %16 = vector.extract_strided_slice %13 {offsets = [0, 0], sizes = [4, 32], strides = [1, 1]} : vector<4x96xf32> to vector<4x32xf32>
    %17 = vector.extract_strided_slice %13 {offsets = [0, 32], sizes = [4, 32], strides = [1, 1]} : vector<4x96xf32> to vector<4x32xf32>
    %18 = vector.extract_strided_slice %13 {offsets = [0, 64], sizes = [4, 32], strides = [1, 1]} : vector<4x96xf32> to vector<4x32xf32>
    %19 = arith.mulf %17, %2 : vector<4x32xf32>
    %20 = arith.mulf %16, %15 : vector<4x32xf32>
    %21 = arith.addf %19, %20 : vector<4x32xf32>
    %22 = math.tanh %21 : vector<4x32xf32>
    %23 = arith.mulf %18, %22 : vector<4x32xf32>
    %24 = arith.index_cast %c0_i32 : i32 to index
    %c0_8 = arith.constant 0 : index
    %c0_9 = arith.constant 0 : index
    %25 = vector.load %arg4[%24, %c0_8, %c0_9] : memref<8x4x32xf32, #tpu.memory_space<vmem>>, vector<1x4x32xf32>
    %26 = vector.shape_cast %25 : vector<1x4x32xf32> to vector<4x32xf32>
    %27 = vector.shape_cast %23 : vector<4x32xf32> to vector<1x4x32xf32>
    tpu.vector_store %arg4[%24, %c0_8, %c0_9], %27 {strides = array<i32>} : memref<8x4x32xf32, #tpu.memory_space<vmem>>, vector<1x4x32xf32>,
    %c1_i32 = arith.constant 1 : i32
    %28 = arith.index_cast %c1_i32 : i32 to index
    %c0_10 = arith.constant 0 : index
    %c0_11 = arith.constant 0 : index
    %29 = vector.load %arg0[%28, %c0_10, %c0_11] : memref<8x4x128xf32, #tpu.memory_space<vmem>>, vector<1x4x128xf32>
    %30 = vector.shape_cast %29 : vector<1x4x128xf32> to vector<4x128xf32>
    %cst_12 = arith.constant dense<0.000000e+00> : vector<4x128xf32>
    %31 = tpu.matmul %23, %0, %cst_12 {dimension_numbers = #tpu.dot_dimension_numbers<[1], [0], [0], [1], [0, 0, 1, 1], [], []>} : vector<4x32xf32>, vector<32x128xf32>, vector<4x128xf32> -> vector<4x128xf32>
    %32 = arith.addf %30, %31 : vector<4x128xf32>
    %33 = vector.extract_strided_slice %32 {offsets = [0, 0], sizes = [4, 96], strides = [1, 1]} : vector<4x128xf32> to vector<4x96xf32>
    %34 = arith.negf %33 : vector<4x96xf32>
    %35 = math.exp %34 : vector<4x96xf32>
    %cst_13 = arith.constant 1.000000e+00 : f32
    %36 = vector.broadcast %cst_13 : f32 to vector<4x96xf32>
    %37 = arith.addf %36, %35 : vector<4x96xf32>
    %38 = arith.divf %36, %37 : vector<4x96xf32>
    %39 = vector.extract_strided_slice %32 {offsets = [0, 96], sizes = [4, 32], strides = [1, 1]} : vector<4x128xf32> to vector<4x32xf32>
    %40 = math.tanh %39 : vector<4x32xf32>
    %41 = vector.extract_strided_slice %38 {offsets = [0, 0], sizes = [4, 32], strides = [1, 1]} : vector<4x96xf32> to vector<4x32xf32>
    %42 = vector.extract_strided_slice %38 {offsets = [0, 32], sizes = [4, 32], strides = [1, 1]} : vector<4x96xf32> to vector<4x32xf32>
    %43 = vector.extract_strided_slice %38 {offsets = [0, 64], sizes = [4, 32], strides = [1, 1]} : vector<4x96xf32> to vector<4x32xf32>
    %44 = arith.mulf %42, %21 : vector<4x32xf32>
    %45 = arith.mulf %41, %40 : vector<4x32xf32>
    %46 = arith.addf %44, %45 : vector<4x32xf32>
    %47 = math.tanh %46 : vector<4x32xf32>
    %48 = arith.mulf %43, %47 : vector<4x32xf32>
    %49 = arith.index_cast %c1_i32 : i32 to index
    %c0_14 = arith.constant 0 : index
    %c0_15 = arith.constant 0 : index
    %50 = vector.load %arg4[%49, %c0_14, %c0_15] : memref<8x4x32xf32, #tpu.memory_space<vmem>>, vector<1x4x32xf32>
    %51 = vector.shape_cast %50 : vector<1x4x32xf32> to vector<4x32xf32>
    %52 = vector.shape_cast %48 : vector<4x32xf32> to vector<1x4x32xf32>
    tpu.vector_store %arg4[%49, %c0_14, %c0_15], %52 {strides = array<i32>} : memref<8x4x32xf32, #tpu.memory_space<vmem>>, vector<1x4x32xf32>,
    %c2_i32 = arith.constant 2 : i32
    %53 = arith.index_cast %c2_i32 : i32 to index
    %c0_16 = arith.constant 0 : index
    %c0_17 = arith.constant 0 : index
    %54 = vector.load %arg0[%53, %c0_16, %c0_17] : memref<8x4x128xf32, #tpu.memory_space<vmem>>, vector<1x4x128xf32>
    %55 = vector.shape_cast %54 : vector<1x4x128xf32> to vector<4x128xf32>
    %cst_18 = arith.constant dense<0.000000e+00> : vector<4x128xf32>
    %56 = tpu.matmul %48, %0, %cst_18 {dimension_numbers = #tpu.dot_dimension_numbers<[1], [0], [0], [1], [0, 0, 1, 1], [], []>} : vector<4x32xf32>, vector<32x128xf32>, vector<4x128xf32> -> vector<4x128xf32>
    %57 = arith.addf %55, %56 : vector<4x128xf32>
    %58 = vector.extract_strided_slice %57 {offsets = [0, 0], sizes = [4, 96], strides = [1, 1]} : vector<4x128xf32> to vector<4x96xf32>
    %59 = arith.negf %58 : vector<4x96xf32>
    %60 = math.exp %59 : vector<4x96xf32>
    %cst_19 = arith.constant 1.000000e+00 : f32
    %61 = vector.broadcast %cst_19 : f32 to vector<4x96xf32>
    %62 = arith.addf %61, %60 : vector<4x96xf32>
    %63 = arith.divf %61, %62 : vector<4x96xf32>
    %64 = vector.extract_strided_slice %57 {offsets = [0, 96], sizes = [4, 32], strides = [1, 1]} : vector<4x128xf32> to vector<4x32xf32>
    %65 = math.tanh %64 : vector<4x32xf32>
    %66 = vector.extract_strided_slice %63 {offsets = [0, 0], sizes = [4, 32], strides = [1, 1]} : vector<4x96xf32> to vector<4x32xf32>
    %67 = vector.extract_strided_slice %63 {offsets = [0, 32], sizes = [4, 32], strides = [1, 1]} : vector<4x96xf32> to vector<4x32xf32>
    %68 = vector.extract_strided_slice %63 {offsets = [0, 64], sizes = [4, 32], strides = [1, 1]} : vector<4x96xf32> to vector<4x32xf32>
    %69 = arith.mulf %67, %46 : vector<4x32xf32>
    %70 = arith.mulf %66, %65 : vector<4x32xf32>
    %71 = arith.addf %69, %70 : vector<4x32xf32>
    %72 = math.tanh %71 : vector<4x32xf32>
    %73 = arith.mulf %68, %72 : vector<4x32xf32>
    %74 = arith.index_cast %c2_i32 : i32 to index
    %c0_20 = arith.constant 0 : index
    %c0_21 = arith.constant 0 : index
    %75 = vector.load %arg4[%74, %c0_20, %c0_21] : memref<8x4x32xf32, #tpu.memory_space<vmem>>, vector<1x4x32xf32>
    %76 = vector.shape_cast %75 : vector<1x4x32xf32> to vector<4x32xf32>
    %77 = vector.shape_cast %73 : vector<4x32xf32> to vector<1x4x32xf32>
    tpu.vector_store %arg4[%74, %c0_20, %c0_21], %77 {strides = array<i32>} : memref<8x4x32xf32, #tpu.memory_space<vmem>>, vector<1x4x32xf32>,
    %c3_i32 = arith.constant 3 : i32
    %78 = arith.index_cast %c3_i32 : i32 to index
    %c0_22 = arith.constant 0 : index
    %c0_23 = arith.constant 0 : index
    %79 = vector.load %arg0[%78, %c0_22, %c0_23] : memref<8x4x128xf32, #tpu.memory_space<vmem>>, vector<1x4x128xf32>
    %80 = vector.shape_cast %79 : vector<1x4x128xf32> to vector<4x128xf32>
    %cst_24 = arith.constant dense<0.000000e+00> : vector<4x128xf32>
    %81 = tpu.matmul %73, %0, %cst_24 {dimension_numbers = #tpu.dot_dimension_numbers<[1], [0], [0], [1], [0, 0, 1, 1], [], []>} : vector<4x32xf32>, vector<32x128xf32>, vector<4x128xf32> -> vector<4x128xf32>
    %82 = arith.addf %80, %81 : vector<4x128xf32>
    %83 = vector.extract_strided_slice %82 {offsets = [0, 0], sizes = [4, 96], strides = [1, 1]} : vector<4x128xf32> to vector<4x96xf32>
    %84 = arith.negf %83 : vector<4x96xf32>
    %85 = math.exp %84 : vector<4x96xf32>
    %cst_25 = arith.constant 1.000000e+00 : f32
    %86 = vector.broadcast %cst_25 : f32 to vector<4x96xf32>
    %87 = arith.addf %86, %85 : vector<4x96xf32>
    %88 = arith.divf %86, %87 : vector<4x96xf32>
    %89 = vector.extract_strided_slice %82 {offsets = [0, 96], sizes = [4, 32], strides = [1, 1]} : vector<4x128xf32> to vector<4x32xf32>
    %90 = math.tanh %89 : vector<4x32xf32>
    %91 = vector.extract_strided_slice %88 {offsets = [0, 0], sizes = [4, 32], strides = [1, 1]} : vector<4x96xf32> to vector<4x32xf32>
    %92 = vector.extract_strided_slice %88 {offsets = [0, 32], sizes = [4, 32], strides = [1, 1]} : vector<4x96xf32> to vector<4x32xf32>
    %93 = vector.extract_strided_slice %88 {offsets = [0, 64], sizes = [4, 32], strides = [1, 1]} : vector<4x96xf32> to vector<4x32xf32>
    %94 = arith.mulf %92, %71 : vector<4x32xf32>
    %95 = arith.mulf %91, %90 : vector<4x32xf32>
    %96 = arith.addf %94, %95 : vector<4x32xf32>
    %97 = math.tanh %96 : vector<4x32xf32>
    %98 = arith.mulf %93, %97 : vector<4x32xf32>
    %99 = arith.index_cast %c3_i32 : i32 to index
    %c0_26 = arith.constant 0 : index
    %c0_27 = arith.constant 0 : index
    %100 = vector.load %arg4[%99, %c0_26, %c0_27] : memref<8x4x32xf32, #tpu.memory_space<vmem>>, vector<1x4x32xf32>
    %101 = vector.shape_cast %100 : vector<1x4x32xf32> to vector<4x32xf32>
    %102 = vector.shape_cast %98 : vector<4x32xf32> to vector<1x4x32xf32>
    tpu.vector_store %arg4[%99, %c0_26, %c0_27], %102 {strides = array<i32>} : memref<8x4x32xf32, #tpu.memory_space<vmem>>, vector<1x4x32xf32>,
    %c4_i32 = arith.constant 4 : i32
    %103 = arith.index_cast %c4_i32 : i32 to index
    %c0_28 = arith.constant 0 : index
    %c0_29 = arith.constant 0 : index
    %104 = vector.load %arg0[%103, %c0_28, %c0_29] : memref<8x4x128xf32, #tpu.memory_space<vmem>>, vector<1x4x128xf32>
    %105 = vector.shape_cast %104 : vector<1x4x128xf32> to vector<4x128xf32>
    %cst_30 = arith.constant dense<0.000000e+00> : vector<4x128xf32>
    %106 = tpu.matmul %98, %0, %cst_30 {dimension_numbers = #tpu.dot_dimension_numbers<[1], [0], [0], [1], [0, 0, 1, 1], [], []>} : vector<4x32xf32>, vector<32x128xf32>, vector<4x128xf32> -> vector<4x128xf32>
    %107 = arith.addf %105, %106 : vector<4x128xf32>
    %108 = vector.extract_strided_slice %107 {offsets = [0, 0], sizes = [4, 96], strides = [1, 1]} : vector<4x128xf32> to vector<4x96xf32>
    %109 = arith.negf %108 : vector<4x96xf32>
    %110 = math.exp %109 : vector<4x96xf32>
    %cst_31 = arith.constant 1.000000e+00 : f32
    %111 = vector.broadcast %cst_31 : f32 to vector<4x96xf32>
    %112 = arith.addf %111, %110 : vector<4x96xf32>
    %113 = arith.divf %111, %112 : vector<4x96xf32>
    %114 = vector.extract_strided_slice %107 {offsets = [0, 96], sizes = [4, 32], strides = [1, 1]} : vector<4x128xf32> to vector<4x32xf32>
    %115 = math.tanh %114 : vector<4x32xf32>
    %116 = vector.extract_strided_slice %113 {offsets = [0, 0], sizes = [4, 32], strides = [1, 1]} : vector<4x96xf32> to vector<4x32xf32>
    %117 = vector.extract_strided_slice %113 {offsets = [0, 32], sizes = [4, 32], strides = [1, 1]} : vector<4x96xf32> to vector<4x32xf32>
    %118 = vector.extract_strided_slice %113 {offsets = [0, 64], sizes = [4, 32], strides = [1, 1]} : vector<4x96xf32> to vector<4x32xf32>
    %119 = arith.mulf %117, %96 : vector<4x32xf32>
    %120 = arith.mulf %116, %115 : vector<4x32xf32>
    %121 = arith.addf %119, %120 : vector<4x32xf32>
    %122 = math.tanh %121 : vector<4x32xf32>
    %123 = arith.mulf %118, %122 : vector<4x32xf32>
    %124 = arith.index_cast %c4_i32 : i32 to index
    %c0_32 = arith.constant 0 : index
    %c0_33 = arith.constant 0 : index
    %125 = vector.load %arg4[%124, %c0_32, %c0_33] : memref<8x4x32xf32, #tpu.memory_space<vmem>>, vector<1x4x32xf32>
    %126 = vector.shape_cast %125 : vector<1x4x32xf32> to vector<4x32xf32>
    %127 = vector.shape_cast %123 : vector<4x32xf32> to vector<1x4x32xf32>
    tpu.vector_store %arg4[%124, %c0_32, %c0_33], %127 {strides = array<i32>} : memref<8x4x32xf32, #tpu.memory_space<vmem>>, vector<1x4x32xf32>,
    %c5_i32 = arith.constant 5 : i32
    %128 = arith.index_cast %c5_i32 : i32 to index
    %c0_34 = arith.constant 0 : index
    %c0_35 = arith.constant 0 : index
    %129 = vector.load %arg0[%128, %c0_34, %c0_35] : memref<8x4x128xf32, #tpu.memory_space<vmem>>, vector<1x4x128xf32>
    %130 = vector.shape_cast %129 : vector<1x4x128xf32> to vector<4x128xf32>
    %cst_36 = arith.constant dense<0.000000e+00> : vector<4x128xf32>
    %131 = tpu.matmul %123, %0, %cst_36 {dimension_numbers = #tpu.dot_dimension_numbers<[1], [0], [0], [1], [0, 0, 1, 1], [], []>} : vector<4x32xf32>, vector<32x128xf32>, vector<4x128xf32> -> vector<4x128xf32>
    %132 = arith.addf %130, %131 : vector<4x128xf32>
    %133 = vector.extract_strided_slice %132 {offsets = [0, 0], sizes = [4, 96], strides = [1, 1]} : vector<4x128xf32> to vector<4x96xf32>
    %134 = arith.negf %133 : vector<4x96xf32>
    %135 = math.exp %134 : vector<4x96xf32>
    %cst_37 = arith.constant 1.000000e+00 : f32
    %136 = vector.broadcast %cst_37 : f32 to vector<4x96xf32>
    %137 = arith.addf %136, %135 : vector<4x96xf32>
    %138 = arith.divf %136, %137 : vector<4x96xf32>
    %139 = vector.extract_strided_slice %132 {offsets = [0, 96], sizes = [4, 32], strides = [1, 1]} : vector<4x128xf32> to vector<4x32xf32>
    %140 = math.tanh %139 : vector<4x32xf32>
    %141 = vector.extract_strided_slice %138 {offsets = [0, 0], sizes = [4, 32], strides = [1, 1]} : vector<4x96xf32> to vector<4x32xf32>
    %142 = vector.extract_strided_slice %138 {offsets = [0, 32], sizes = [4, 32], strides = [1, 1]} : vector<4x96xf32> to vector<4x32xf32>
    %143 = vector.extract_strided_slice %138 {offsets = [0, 64], sizes = [4, 32], strides = [1, 1]} : vector<4x96xf32> to vector<4x32xf32>
    %144 = arith.mulf %142, %121 : vector<4x32xf32>
    %145 = arith.mulf %141, %140 : vector<4x32xf32>
    %146 = arith.addf %144, %145 : vector<4x32xf32>
    %147 = math.tanh %146 : vector<4x32xf32>
    %148 = arith.mulf %143, %147 : vector<4x32xf32>
    %149 = arith.index_cast %c5_i32 : i32 to index
    %c0_38 = arith.constant 0 : index
    %c0_39 = arith.constant 0 : index
    %150 = vector.load %arg4[%149, %c0_38, %c0_39] : memref<8x4x32xf32, #tpu.memory_space<vmem>>, vector<1x4x32xf32>
    %151 = vector.shape_cast %150 : vector<1x4x32xf32> to vector<4x32xf32>
    %152 = vector.shape_cast %148 : vector<4x32xf32> to vector<1x4x32xf32>
    tpu.vector_store %arg4[%149, %c0_38, %c0_39], %152 {strides = array<i32>} : memref<8x4x32xf32, #tpu.memory_space<vmem>>, vector<1x4x32xf32>,
    %c6_i32 = arith.constant 6 : i32
    %153 = arith.index_cast %c6_i32 : i32 to index
    %c0_40 = arith.constant 0 : index
    %c0_41 = arith.constant 0 : index
    %154 = vector.load %arg0[%153, %c0_40, %c0_41] : memref<8x4x128xf32, #tpu.memory_space<vmem>>, vector<1x4x128xf32>
    %155 = vector.shape_cast %154 : vector<1x4x128xf32> to vector<4x128xf32>
    %cst_42 = arith.constant dense<0.000000e+00> : vector<4x128xf32>
    %156 = tpu.matmul %148, %0, %cst_42 {dimension_numbers = #tpu.dot_dimension_numbers<[1], [0], [0], [1], [0, 0, 1, 1], [], []>} : vector<4x32xf32>, vector<32x128xf32>, vector<4x128xf32> -> vector<4x128xf32>
    %157 = arith.addf %155, %156 : vector<4x128xf32>
    %158 = vector.extract_strided_slice %157 {offsets = [0, 0], sizes = [4, 96], strides = [1, 1]} : vector<4x128xf32> to vector<4x96xf32>
    %159 = arith.negf %158 : vector<4x96xf32>
    %160 = math.exp %159 : vector<4x96xf32>
    %cst_43 = arith.constant 1.000000e+00 : f32
    %161 = vector.broadcast %cst_43 : f32 to vector<4x96xf32>
    %162 = arith.addf %161, %160 : vector<4x96xf32>
    %163 = arith.divf %161, %162 : vector<4x96xf32>
    %164 = vector.extract_strided_slice %157 {offsets = [0, 96], sizes = [4, 32], strides = [1, 1]} : vector<4x128xf32> to vector<4x32xf32>
    %165 = math.tanh %164 : vector<4x32xf32>
    %166 = vector.extract_strided_slice %163 {offsets = [0, 0], sizes = [4, 32], strides = [1, 1]} : vector<4x96xf32> to vector<4x32xf32>
    %167 = vector.extract_strided_slice %163 {offsets = [0, 32], sizes = [4, 32], strides = [1, 1]} : vector<4x96xf32> to vector<4x32xf32>
    %168 = vector.extract_strided_slice %163 {offsets = [0, 64], sizes = [4, 32], strides = [1, 1]} : vector<4x96xf32> to vector<4x32xf32>
    %169 = arith.mulf %167, %146 : vector<4x32xf32>
    %170 = arith.mulf %166, %165 : vector<4x32xf32>
    %171 = arith.addf %169, %170 : vector<4x32xf32>
    %172 = math.tanh %171 : vector<4x32xf32>
    %173 = arith.mulf %168, %172 : vector<4x32xf32>
    %174 = arith.index_cast %c6_i32 : i32 to index
    %c0_44 = arith.constant 0 : index
    %c0_45 = arith.constant 0 : index
    %175 = vector.load %arg4[%174, %c0_44, %c0_45] : memref<8x4x32xf32, #tpu.memory_space<vmem>>, vector<1x4x32xf32>
    %176 = vector.shape_cast %175 : vector<1x4x32xf32> to vector<4x32xf32>
    %177 = vector.shape_cast %173 : vector<4x32xf32> to vector<1x4x32xf32>
    tpu.vector_store %arg4[%174, %c0_44, %c0_45], %177 {strides = array<i32>} : memref<8x4x32xf32, #tpu.memory_space<vmem>>, vector<1x4x32xf32>,
    %c7_i32 = arith.constant 7 : i32
    %178 = arith.index_cast %c7_i32 : i32 to index
    %c0_46 = arith.constant 0 : index
    %c0_47 = arith.constant 0 : index
    %179 = vector.load %arg0[%178, %c0_46, %c0_47] : memref<8x4x128xf32, #tpu.memory_space<vmem>>, vector<1x4x128xf32>
    %180 = vector.shape_cast %179 : vector<1x4x128xf32> to vector<4x128xf32>
    %cst_48 = arith.constant dense<0.000000e+00> : vector<4x128xf32>
    %181 = tpu.matmul %173, %0, %cst_48 {dimension_numbers = #tpu.dot_dimension_numbers<[1], [0], [0], [1], [0, 0, 1, 1], [], []>} : vector<4x32xf32>, vector<32x128xf32>, vector<4x128xf32> -> vector<4x128xf32>
    %182 = arith.addf %180, %181 : vector<4x128xf32>
    %183 = vector.extract_strided_slice %182 {offsets = [0, 0], sizes = [4, 96], strides = [1, 1]} : vector<4x128xf32> to vector<4x96xf32>
    %184 = arith.negf %183 : vector<4x96xf32>
    %185 = math.exp %184 : vector<4x96xf32>
    %cst_49 = arith.constant 1.000000e+00 : f32
    %186 = vector.broadcast %cst_49 : f32 to vector<4x96xf32>
    %187 = arith.addf %186, %185 : vector<4x96xf32>
    %188 = arith.divf %186, %187 : vector<4x96xf32>
    %189 = vector.extract_strided_slice %182 {offsets = [0, 96], sizes = [4, 32], strides = [1, 1]} : vector<4x128xf32> to vector<4x32xf32>
    %190 = math.tanh %189 : vector<4x32xf32>
    %191 = vector.extract_strided_slice %188 {offsets = [0, 0], sizes = [4, 32], strides = [1, 1]} : vector<4x96xf32> to vector<4x32xf32>
    %192 = vector.extract_strided_slice %188 {offsets = [0, 32], sizes = [4, 32], strides = [1, 1]} : vector<4x96xf32> to vector<4x32xf32>
    %193 = vector.extract_strided_slice %188 {offsets = [0, 64], sizes = [4, 32], strides = [1, 1]} : vector<4x96xf32> to vector<4x32xf32>
    %194 = arith.mulf %192, %171 : vector<4x32xf32>
    %195 = arith.mulf %191, %190 : vector<4x32xf32>
    %196 = arith.addf %194, %195 : vector<4x32xf32>
    %197 = math.tanh %196 : vector<4x32xf32>
    %198 = arith.mulf %193, %197 : vector<4x32xf32>
    %199 = arith.index_cast %c7_i32 : i32 to index
    %c0_50 = arith.constant 0 : index
    %c0_51 = arith.constant 0 : index
    %200 = vector.load %arg4[%199, %c0_50, %c0_51] : memref<8x4x32xf32, #tpu.memory_space<vmem>>, vector<1x4x32xf32>
    %201 = vector.shape_cast %200 : vector<1x4x32xf32> to vector<4x32xf32>
    %202 = vector.shape_cast %198 : vector<4x32xf32> to vector<1x4x32xf32>
    tpu.vector_store %arg4[%199, %c0_50, %c0_51], %202 {strides = array<i32>} : memref<8x4x32xf32, #tpu.memory_space<vmem>>, vector<1x4x32xf32>,
    %c8_i32 = arith.constant 8 : i32
    %c0_52 = arith.constant 0 : index
    %c0_53 = arith.constant 0 : index
    %203 = vector.load %arg5[%c0_52, %c0_53] : memref<4x32xf32, #tpu.memory_space<vmem>>, vector<4x32xf32>
    tpu.vector_store %arg5[%c0_52, %c0_53], %198 {strides = array<i32>} : memref<4x32xf32, #tpu.memory_space<vmem>>, vector<4x32xf32>,
    %c0_54 = arith.constant 0 : index
    %c0_55 = arith.constant 0 : index
    %204 = vector.load %arg6[%c0_54, %c0_55] : memref<4x32xf32, #tpu.memory_space<vmem>>, vector<4x32xf32>
    tpu.vector_store %arg6[%c0_54, %c0_55], %196 {strides = array<i32>} : memref<4x32xf32, #tpu.memory_space<vmem>>, vector<4x32xf32>,
    return
  }
}

</mosaic_0001>

<bundles_post_ra>
// kernel: tpu_custom_call.1
= control target key start
LH: loop header
LB: loop body
LE: loop exit
PB: predicated region body
PF: predicated region fallthrough
CT: control target
= control target key end

     0   :  { %12 = vsyncpa [#allocation3], 0  ;;  %s1578_s0 = inlined_call_operand.hbm [shape: f32[8,4,128], index: 0, kind: input, shape index: {}]   ;;  %s1579_s1 = inlined_call_operand.hbm [shape: f32[32,128], index: 1, kind: input, shape index: {}]   ;;  %s1580_s2 = inlined_call_operand.vmem [shape: f32[4,32], index: 2, kind: input, shape index: {}]   ;;  %s1581_s3 = inlined_call_operand.vmem [shape: f32[4,32], index: 3, kind: input, shape index: {}]   ;;  %s1582_s4 = inlined_call_operand.hbm [shape: f32[8,4,32], index: 4, kind: output, shape index: {0}]   ;;  %s1583_s5 = inlined_call_operand.hbm [shape: f32[4,32], index: 5, kind: output, shape index: {1}]   ;;  %s1584_s6 = inlined_call_operand.hbm [shape: f32[4,32], index: 6, kind: output, shape index: {2}]  }
   0x1   :  { %13 = vsyncpa [#allocation6], 0 }
   0x2   :  { %14 = vsyncpa [#allocation4], 0 }
   0x3   :  { %15 = vsyncpa [#allocation9], 0  ;;  %s1340_s21 = smov [#allocation2]   ;;  %s1222_s25 = scalar_lea.hbm %s1578_s0, 512 }
   0x4   :  { %s21_s22 = sshll.u32 %s1340_s21, 4  ;;  %p1223_p0 = scmp.ne.s32.totalorder %s1578_s0, %s1222_s25  ;;  %s22_s22 = int_to_ptr.vmem [resolvable:$true] %s21_s22 }
   0x5   :  { %p1226_p1 = scmp.lt.u32.totalorder %s1222_s25, %s1578_s0 }
   0x7   :  { %p1228_p2 = pnand %p1226_p1, %p1223_p0 }
   0x9   :  { %1231 = shalt.err (!%p1228_p2)
}
   0xa   :  { %s1232_s30 = scalar_lea.vmem %s22_s22, 512  ;;  %p1237_p4 = scmp.lt.s32.totalorder %s22_s22, %s22_s22 }
   0xb   :  { %p1233_p3 = scmp.ne.s32.totalorder %s22_s22, %s1232_s30  ;;  %p1238_p5 = scmp.lt.s32.totalorder %s1232_s30, %s1232_s30 }
   0xd   :  { %p1239_p6 = por %p1238_p5, %p1237_p4 }
   0xf   :  { %p1240_p7 = pnand %p1239_p6, %p1233_p3 }
  0x11   :  { %1243 = shalt.err (!%p1240_p7)
}
  0x12   :  { %s1341_s7 = smov 64   ;;  %s1342_s8 = smov 4  }
  0x13   :  { %27 = dma.hbm_to_vmem [thread:$0]  %s1578_s0, 512, %s22_s22, [#allocation3], %s1341_s7, %s1341_s7, %s1342_s8  }
  0x14   :  { %s1343_s11 = smov [#allocation5]   ;;  %s1244_s15 = scalar_lea.hbm %s1579_s1, 512 }
  0x15   :  { %s33_s12 = sshll.u32 %s1343_s11, 4  ;;  %p1245_p8 = scmp.ne.s32.totalorder %s1579_s1, %s1244_s15  ;;  %s34_s12 = int_to_ptr.vmem [resolvable:$true] %s33_s12 }
  0x16   :  { %p1248_p9 = scmp.lt.u32.totalorder %s1244_s15, %s1579_s1 }
  0x18   :  { %p1250_p10 = pnand %p1248_p9, %p1245_p8 }
  0x1a   :  { %1253 = shalt.err (!%p1250_p10)
}
  0x1b   :  { %s1254_s20 = scalar_lea.vmem %s34_s12, 512  ;;  %p1259_p12 = scmp.lt.s32.totalorder %s34_s12, %s34_s12 }
  0x1c   :  { %p1255_p11 = scmp.ne.s32.totalorder %s34_s12, %s1254_s20  ;;  %p1260_p13 = scmp.lt.s32.totalorder %s1254_s20, %s1254_s20 }
  0x1e   :  { %p1261_p0 = por %p1260_p13, %p1259_p12 }
  0x20   :  { %p1262_p1 = pnand %p1261_p0, %p1255_p11 }
  0x22   :  { %1265 = shalt.err (!%p1262_p1)
}
  0x23   :  { %s1344_s0 = smov 128   ;;  %s1345_s21 = smov 8  }
  0x24   :  { %39 = dma.hbm_to_vmem [thread:$0]  %s1579_s1, 512, %s34_s12, [#allocation6], %s1344_s0, %s1344_s0, %s1345_s21  }
  0x25   :  { %1332 = dma.done.wait [#allocation3], 512  }
  0x26   :  { %1333 = vsyncadd [#allocation3], 4294966784 }
  0x27   :  { %1334 = dma.done.wait [#allocation6], 512  }
  0x28   :  { %1335 = vsyncadd [#allocation6], 4294966784  ;;  %v1346_v0 = vmov 0.0|0.0   ;;  %vm1347_vm0 = vmmov 0   ;;  %v1348_v1 = vmov 0.0   ;;  %v50_v2 = vld [vmem:[#allocation5] sm:$0xff] }
  0x29   :  { %1096 = vmatprep.subr.bf16.mxu0 %v1346_v0  ;;  %1016 = vmatprep.mubr.msk.f32.mxu0 %vm1347_vm0, %v1348_v1  ;;  %v51_v3 = vld [vmem:[#allocation5 + $0x8] sm:$0xff]  ;;  %v52_v4 = vld [vmem:[#allocation5 + $0x10] sm:$0xff]  ;;  %v53_v6 = vld [vmem:[#allocation5 + $0x18] sm:$0xff]  ;;  %vm57_vm1 = vcmask 261120   ;;  %vm164_vm2 = vcmask 257024   ;;  %s1351_s27 = smov [#allocation8]  }
  0x2a   :  { %1102 = vmatprep.subr.bf16.mxu1 %v1346_v0  ;;  %1027 = vmatprep.mubr.msk.f32.mxu1 %vm1347_vm0, %v1348_v1  ;;  %v1422_v5 = vpack.c.bf16 %v51_v3, %v50_v2  ;;  %v1425_v7 = vpack.c.bf16 %v53_v6, %v52_v4  ;;  %v54_v8 = vld [vmem:[%s1580_s2] sm:$0xf]  ;;  %s1349_s2 = smov 32   ;;  %v167_v29 = vld [vmem:[#allocation2 + $0x4] sm:$0xf]  ;;  %s925_s28 = sshll.u32 %s1351_s27, 4  ;;  %s926_s28 = int_to_ptr.vmem [resolvable:$true] %s925_s28 }
  0x2b   :  { %v56_v9 = vld [vmem:[#allocation2] sm:$0xf]  ;;  %v272_v47 = vld [vmem:[#allocation2 + $0x8] sm:$0xf]  ;;  %v377_v3 = vld [vmem:[#allocation2 + $0xc] sm:$0xf]  ;;  %p1271_p3 = scmp.lt.s32.totalorder %s926_s28, %s926_s28 }
  0x2c   :  { %1098 = vmatpush3.bf16.msra.mxu0 %v1422_v5  ;;  %1104 = vmatpush3.bf16.msra.mxu1 %v1422_v5  ;;  %v55_v14 = vld [vmem:[%s1581_s3] sm:$0xf]  ;;  %s1350_s3 = smov 96   ;;  %s1352_s29 = smov [#allocation7]  }
  0x2d   :  { %1099 = vmatprep.subr.bf16.mxu0 %v1346_v0  ;;  %1105 = vmatprep.subr.bf16.mxu1 %v1346_v0  ;;  %s912_s30 = sshll.u32 %s1352_s29, 4  ;;  %s1353_s9 = smov [#allocation10]   ;;  %s1523_s30 = int_to_ptr.vmem [resolvable:$true] %s912_s30 }
  0x2e   :  { %s935_s10 = sshll.u32 %s1353_s9, 4  ;;  %s1266_s11 = scalar_lea.vmem %s926_s28, 64  ;;  %s1527_s10 = int_to_ptr.vmem [resolvable:$true] %s935_s10 }
  0x2f   :  { %p1267_p2 = scmp.ne.s32.totalorder %s926_s28, %s1266_s11  ;;  %p1272_p4 = scmp.lt.s32.totalorder %s1266_s11, %s1266_s11 }
  0x30   :  { %1101 = vmatpush3.bf16.msra.mxu0 %v1425_v7  ;;  %1107 = vmatpush3.bf16.msra.mxu1 %v1425_v7 }
  0x31   :  { %1108 = vmatprep.subr.bf16.mxu0 %v1346_v0  ;;  %1114 = vmatprep.subr.bf16.mxu1 %v1346_v0  ;;  %p1273_p5 = por %p1272_p4, %p1271_p3 }
  0x33   :  { %1017 = vmatmul.mubr.msk.f32.vlgmr.msra.gmra.mrb[0].mxu0 %vm57_vm1, %v54_v8  ;;  %p1274_p6 = pnand %p1273_p5, %p1267_p2 }
  0x34   :  { %1110 = vmatpush3.bf16.msra.mxu0 %v1422_v5  ;;  %1038 = vmatprep.mubr.msk.f32.mxu0 %vm1347_vm0, %v1348_v1 }
  0x35   :  { %1111 = vmatprep.subr.bf16.mxu0 %v1346_v0 }
  0x38   :  { %1113 = vmatpush3.bf16.msra.mxu0 %v1425_v7 }
  0x39   :  { %1120 = vmatprep.subr.bf16.mxu0 %v1346_v0 }
 0x106   :  { %v127_v10 = vpop.f32.mrb[0].mxu0 }
 0x107   :  { %v131_v11 = vadd.f32 %v127_v10, %v56_v9  ;;  %v1018_v12 = vpop.f32.mrb[1].mxu0 }
 0x109   :  { %1158 = vtanh.f32 %v131_v11  ;;  %v953_v15 = vmul.f32 -1.442695, %v131_v11 }
 0x10b   :  { %1160 = vpow2.f32 %v953_v15 }
 0x113   :  { %v1159_v13 = vpop.eup %1158 }
 0x114   :  { %145 = vrot.lane.b32.xlu0 %v1159_v13, %s1349_s2 }
 0x115   :  { %v1161_v16 = vpop.eup %1160 }
 0x116   :  { %v135_v17 = vadd.f32 1.0, %v1161_v16 }
 0x118   :  { %140 = vrot.lane.b32.xlu0 %v55_v14, %s1349_s2  ;;  %1162 = vrcp.f32 %v135_v17 }
 0x122   :  { %v1163_v18 = vpop.eup %1162 }
 0x186   :  { %v146_v19 = vpop.permute.xlu0 %145 }
 0x187   :  { %v148_v20 = vmul.f32 %v1163_v18, %v146_v19 }
 0x189   :  { %150 = vrot.lane.b32.xlu1 %v148_v20, %s1349_s2 }
 0x18a   :  { %v141_v21 = vpop.permute.xlu0 %140 }
 0x18b   :  { %v143_v22 = vmul.f32 %v1163_v18, %v141_v21 }
 0x1fb   :  { %v151_v23 = vpop.permute.xlu1 %150 }
 0x1fc   :  { %v153_v24 = vadd.f32 %v151_v23, %v143_v22  ;;  %v482_v23 = vld [vmem:[#allocation2 + $0x10] sm:$0xf] }
 0x1fe   :  { %1164 = vtanh.f32 %v153_v24 }
 0x208   :  { %v1165_v25 = vpop.eup %1164 }
 0x209   :  { %156 = vrot.lane.b32.xlu1 %v1165_v25, %s1349_s2 }
 0x27b   :  { %v157_v26 = vpop.permute.xlu1 %156 }
 0x27c   :  { %v159_v27 = vmul.f32 %v1163_v18, %v157_v26 }
 0x27e   :  { %161 = vrot.lane.b32.xlu0 %v159_v27, %s1341_s7 }
 0x2f0   :  { %v162_v28 = vpop.permute.xlu0 %161 }
 0x2f1   :  { %165 = vst.msk [vmem:[#allocation7] sm:$0xf] %vm164_vm2, %v162_v28  ;;  %1028 = vmatmul.mubr.msk.f32.vlgmr.msra.gmra.mrb[0].mxu1 %vm57_vm1, %v162_v28 }
 0x2f2   :  { %1116 = vmatpush3.bf16.msra.mxu1 %v1422_v5  ;;  %1049 = vmatprep.mubr.msk.f32.mxu1 %vm1347_vm0, %v1348_v1 }
 0x2f3   :  { %1117 = vmatprep.subr.bf16.mxu1 %v1346_v0 }
 0x2f6   :  { %1119 = vmatpush3.bf16.msra.mxu1 %v1425_v7 }
 0x2f7   :  { %1126 = vmatprep.subr.bf16.mxu1 %v1346_v0 }
 0x3c4   :  { %v236_v30 = vpop.f32.mrb[0].mxu1 }
 0x3c5   :  { %v240_v31 = vadd.f32 %v236_v30, %v167_v29  ;;  %v1029_v32 = vpop.f32.mrb[1].mxu1 }
 0x3c7   :  { %1166 = vtanh.f32 %v240_v31  ;;  %v955_v34 = vmul.f32 -1.442695, %v240_v31 }
 0x3c9   :  { %1168 = vpow2.f32 %v955_v34 }
 0x3d1   :  { %v1167_v33 = vpop.eup %1166 }
 0x3d2   :  { %250 = vrot.lane.b32.xlu1 %v1167_v33, %s1349_s2 }
 0x3d3   :  { %v1169_v35 = vpop.eup %1168 }
 0x3d4   :  { %v244_v36 = vadd.f32 1.0, %v1169_v35 }
 0x3d6   :  { %1170 = vrcp.f32 %v244_v36 }
 0x3e0   :  { %v1171_v37 = vpop.eup %1170 }
 0x3e1   :  { %v248_v40 = vmul.f32 %v1171_v37, %v153_v24 }
 0x444   :  { %v251_v38 = vpop.permute.xlu1 %250 }
 0x445   :  { %v253_v39 = vmul.f32 %v1171_v37, %v251_v38 }
 0x447   :  { %255 = vrot.lane.b32.xlu0 %v253_v39, %s1349_s2 }
 0x4b9   :  { %v256_v41 = vpop.permute.xlu0 %255 }
 0x4ba   :  { %v258_v42 = vadd.f32 %v256_v41, %v248_v40  ;;  %v587_v41 = vld [vmem:[#allocation2 + $0x14] sm:$0xf] }
 0x4bc   :  { %1172 = vtanh.f32 %v258_v42 }
 0x4c6   :  { %v1173_v43 = vpop.eup %1172 }
 0x4c7   :  { %261 = vrot.lane.b32.xlu1 %v1173_v43, %s1349_s2 }
 0x539   :  { %v262_v44 = vpop.permute.xlu1 %261 }
 0x53a   :  { %v264_v45 = vmul.f32 %v1171_v37, %v262_v44 }
 0x53c   :  { %266 = vrot.lane.b32.xlu0 %v264_v45, %s1341_s7 }
 0x5ae   :  { %v267_v46 = vpop.permute.xlu0 %266 }
 0x5af   :  { %270 = vst.msk [vmem:[#allocation7 + $0x4] sm:$0xf] %vm164_vm2, %v267_v46  ;;  %1039 = vmatmul.mubr.msk.f32.vlgmr.msra.gmra.mrb[2].mxu0 %vm57_vm1, %v267_v46 }
 0x5b0   :  { %1122 = vmatpush3.bf16.msra.mxu0 %v1422_v5  ;;  %1060 = vmatprep.mubr.msk.f32.mxu0 %vm1347_vm0, %v1348_v1 }
 0x5b1   :  { %1123 = vmatprep.subr.bf16.mxu0 %v1346_v0 }
 0x5b4   :  { %1125 = vmatpush3.bf16.msra.mxu0 %v1425_v7 }
 0x5b5   :  { %1132 = vmatprep.subr.bf16.mxu0 %v1346_v0 }
 0x682   :  { %v341_v48 = vpop.f32.mrb[2].mxu0 }
 0x683   :  { %v345_v49 = vadd.f32 %v341_v48, %v272_v47  ;;  %v1040_v50 = vpop.f32.mrb[3].mxu0 }
 0x685   :  { %1174 = vtanh.f32 %v345_v49  ;;  %v957_v52 = vmul.f32 -1.442695, %v345_v49 }
 0x687   :  { %1176 = vpow2.f32 %v957_v52 }
 0x68f   :  { %v1175_v51 = vpop.eup %1174 }
 0x690   :  { %355 = vrot.lane.b32.xlu1 %v1175_v51, %s1349_s2 }
 0x691   :  { %v1177_v53 = vpop.eup %1176 }
 0x692   :  { %v349_v54 = vadd.f32 1.0, %v1177_v53 }
 0x694   :  { %1178 = vrcp.f32 %v349_v54 }
 0x69e   :  { %v1179_v55 = vpop.eup %1178 }
 0x69f   :  { %v353_v58 = vmul.f32 %v1179_v55, %v258_v42 }
 0x702   :  { %v356_v56 = vpop.permute.xlu1 %355 }
 0x703   :  { %v358_v57 = vmul.f32 %v1179_v55, %v356_v56 }
 0x705   :  { %360 = vrot.lane.b32.xlu0 %v358_v57, %s1349_s2 }
 0x777   :  { %v361_v59 = vpop.permute.xlu0 %360 }
 0x778   :  { %v363_v60 = vadd.f32 %v361_v59, %v353_v58 }
 0x77a   :  { %1180 = vtanh.f32 %v363_v60 }
 0x784   :  { %v1181_v61 = vpop.eup %1180 }
 0x785   :  { %366 = vrot.lane.b32.xlu1 %v1181_v61, %s1349_s2 }
 0x7f7   :  { %v367_v62 = vpop.permute.xlu1 %366 }
 0x7f8   :  { %v369_v63 = vmul.f32 %v1179_v55, %v367_v62  ;;  %v692_v55 = vld [vmem:[#allocation2 + $0x18] sm:$0xf] }
 0x7fa   :  { %371 = vrot.lane.b32.xlu0 %v369_v63, %s1341_s7 }
 0x86c   :  { %v372_v2 = vpop.permute.xlu0 %371 }
 0x86d   :  { %375 = vst.msk [vmem:[#allocation7 + $0x8] sm:$0xf] %vm164_vm2, %v372_v2  ;;  %1050 = vmatmul.mubr.msk.f32.vlgmr.msra.gmra.mrb[2].mxu1 %vm57_vm1, %v372_v2 }
 0x86e   :  { %1128 = vmatpush3.bf16.msra.mxu1 %v1422_v5  ;;  %1071 = vmatprep.mubr.msk.f32.mxu1 %vm1347_vm0, %v1348_v1 }
 0x86f   :  { %1129 = vmatprep.subr.bf16.mxu1 %v1346_v0 }
 0x872   :  { %1131 = vmatpush3.bf16.msra.mxu1 %v1425_v7 }
 0x873   :  { %1138 = vmatprep.subr.bf16.mxu1 %v1346_v0 }
 0x940   :  { %v446_v4 = vpop.f32.mrb[2].mxu1 }
 0x941   :  { %v450_v6 = vadd.f32 %v446_v4, %v377_v3  ;;  %v1051_v8 = vpop.f32.mrb[3].mxu1 }
 0x943   :  { %1182 = vtanh.f32 %v450_v6  ;;  %v959_v10 = vmul.f32 -1.442695, %v450_v6 }
 0x945   :  { %1184 = vpow2.f32 %v959_v10 }
 0x94d   :  { %v1183_v9 = vpop.eup %1182 }
 0x94e   :  { %460 = vrot.lane.b32.xlu1 %v1183_v9, %s1349_s2 }
 0x94f   :  { %v1185_v11 = vpop.eup %1184 }
 0x950   :  { %v454_v12 = vadd.f32 1.0, %v1185_v11 }
 0x952   :  { %1186 = vrcp.f32 %v454_v12 }
 0x95c   :  { %v1187_v13 = vpop.eup %1186 }
 0x95d   :  { %v458_v16 = vmul.f32 %v1187_v13, %v363_v60 }
 0x9c0   :  { %v461_v14 = vpop.permute.xlu1 %460 }
 0x9c1   :  { %v463_v15 = vmul.f32 %v1187_v13, %v461_v14 }
 0x9c3   :  { %465 = vrot.lane.b32.xlu0 %v463_v15, %s1349_s2 }
 0xa35   :  { %v466_v17 = vpop.permute.xlu0 %465 }
 0xa36   :  { %v468_v18 = vadd.f32 %v466_v17, %v458_v16 }
 0xa38   :  { %1188 = vtanh.f32 %v468_v18 }
 0xa42   :  { %v1189_v19 = vpop.eup %1188 }
 0xa43   :  { %471 = vrot.lane.b32.xlu1 %v1189_v19, %s1349_s2 }
 0xab5   :  { %v472_v20 = vpop.permute.xlu1 %471 }
 0xab6   :  { %v474_v21 = vmul.f32 %v1187_v13, %v472_v20  ;;  %v797_v13 = vld [vmem:[#allocation2 + $0x1c] sm:$0xf] }
 0xab8   :  { %476 = vrot.lane.b32.xlu0 %v474_v21, %s1341_s7 }
 0xb2a   :  { %v477_v22 = vpop.permute.xlu0 %476 }
 0xb2b   :  { %480 = vst.msk [vmem:[#allocation7 + $0xc] sm:$0xf] %vm164_vm2, %v477_v22  ;;  %1061 = vmatmul.mubr.msk.f32.vlgmr.msra.gmra.mrb[4].mxu0 %vm57_vm1, %v477_v22 }
 0xb2c   :  { %1134 = vmatpush3.bf16.msra.mxu0 %v1422_v5  ;;  %1082 = vmatprep.mubr.msk.f32.mxu0 %vm1347_vm0, %v1348_v1 }
 0xb2d   :  { %1135 = vmatprep.subr.bf16.mxu0 %v1346_v0 }
 0xb30   :  { %1137 = vmatpush3.bf16.msra.mxu0 %v1425_v7 }
 0xbfe   :  { %v551_v24 = vpop.f32.mrb[4].mxu0 }
 0xbff   :  { %v555_v25 = vadd.f32 %v551_v24, %v482_v23  ;;  %v1062_v26 = vpop.f32.mrb[5].mxu0 }
 0xc01   :  { %1190 = vtanh.f32 %v555_v25  ;;  %v961_v28 = vmul.f32 -1.442695, %v555_v25 }
 0xc03   :  { %1192 = vpow2.f32 %v961_v28 }
 0xc0b   :  { %v1191_v27 = vpop.eup %1190 }
 0xc0c   :  { %565 = vrot.lane.b32.xlu1 %v1191_v27, %s1349_s2 }
 0xc0d   :  { %v1193_v29 = vpop.eup %1192 }
 0xc0e   :  { %v559_v30 = vadd.f32 1.0, %v1193_v29 }
 0xc10   :  { %1194 = vrcp.f32 %v559_v30 }
 0xc1a   :  { %v1195_v31 = vpop.eup %1194 }
 0xc1b   :  { %v563_v34 = vmul.f32 %v1195_v31, %v468_v18 }
 0xc7e   :  { %v566_v32 = vpop.permute.xlu1 %565 }
 0xc7f   :  { %v568_v33 = vmul.f32 %v1195_v31, %v566_v32 }
 0xc81   :  { %570 = vrot.lane.b32.xlu0 %v568_v33, %s1349_s2 }
 0xcf3   :  { %v571_v35 = vpop.permute.xlu0 %570 }
 0xcf4   :  { %v573_v36 = vadd.f32 %v571_v35, %v563_v34 }
 0xcf6   :  { %1196 = vtanh.f32 %v573_v36 }
 0xd00   :  { %v1197_v37 = vpop.eup %1196 }
 0xd01   :  { %576 = vrot.lane.b32.xlu1 %v1197_v37, %s1349_s2 }
 0xd73   :  { %v577_v38 = vpop.permute.xlu1 %576 }
 0xd74   :  { %v579_v39 = vmul.f32 %v1195_v31, %v577_v38 }
 0xd76   :  { %581 = vrot.lane.b32.xlu0 %v579_v39, %s1341_s7 }
 0xde8   :  { %v582_v40 = vpop.permute.xlu0 %581 }
 0xde9   :  { %585 = vst.msk [vmem:[#allocation7 + $0x10] sm:$0xf] %vm164_vm2, %v582_v40  ;;  %1072 = vmatmul.mubr.msk.f32.vlgmr.msra.gmra.mrb[4].mxu1 %vm57_vm1, %v582_v40 }
 0xdea   :  { %1140 = vmatpush3.bf16.msra.mxu1 %v1422_v5  ;;  %1093 = vmatprep.mubr.msk.f32.mxu1 %vm1347_vm0, %v1348_v1 }
 0xdeb   :  { %1141 = vmatprep.subr.bf16.mxu1 %v1346_v0 }
 0xdee   :  { %1143 = vmatpush3.bf16.msra.mxu1 %v1425_v7 }
 0xebc   :  { %v656_v42 = vpop.f32.mrb[4].mxu1 }
 0xebd   :  { %v660_v43 = vadd.f32 %v656_v42, %v587_v41  ;;  %v1073_v44 = vpop.f32.mrb[5].mxu1 }
 0xebf   :  { %1198 = vtanh.f32 %v660_v43  ;;  %v963_v46 = vmul.f32 -1.442695, %v660_v43 }
 0xec1   :  { %1200 = vpow2.f32 %v963_v46 }
 0xec9   :  { %v1199_v45 = vpop.eup %1198 }
 0xeca   :  { %670 = vrot.lane.b32.xlu1 %v1199_v45, %s1349_s2 }
 0xecb   :  { %v1201_v47 = vpop.eup %1200 }
 0xecc   :  { %v664_v48 = vadd.f32 1.0, %v1201_v47 }
 0xece   :  { %1202 = vrcp.f32 %v664_v48 }
 0xed8   :  { %v1203_v5 = vpop.eup %1202 }
 0xed9   :  { %v668_v0 = vmul.f32 %v1203_v5, %v573_v36 }
 0xf3c   :  { %v671_v49 = vpop.permute.xlu1 %670 }
 0xf3d   :  { %v673_v1 = vmul.f32 %v1203_v5, %v671_v49 }
 0xf3f   :  { %675 = vrot.lane.b32.xlu0 %v673_v1, %s1349_s2 }
 0xfb1   :  { %v676_v7 = vpop.permute.xlu0 %675 }
 0xfb2   :  { %v678_v50 = vadd.f32 %v676_v7, %v668_v0 }
 0xfb4   :  { %1204 = vtanh.f32 %v678_v50 }
 0xfbe   :  { %v1205_v51 = vpop.eup %1204 }
 0xfbf   :  { %681 = vrot.lane.b32.xlu1 %v1205_v51, %s1349_s2 }
0x1031   :  { %v682_v52 = vpop.permute.xlu1 %681 }
0x1032   :  { %v684_v53 = vmul.f32 %v1203_v5, %v682_v52 }
0x1034   :  { %686 = vrot.lane.b32.xlu0 %v684_v53, %s1341_s7 }
0x10a6   :  { %v687_v54 = vpop.permute.xlu0 %686 }
0x10a7   :  { %690 = vst.msk [vmem:[#allocation7 + $0x14] sm:$0xf] %vm164_vm2, %v687_v54  ;;  %1083 = vmatmul.mubr.msk.f32.vlgmr.msra.gmra.mrb[6].mxu0 %vm57_vm1, %v687_v54 }
0x117a   :  { %v761_v56 = vpop.f32.mrb[6].mxu0 }
0x117b   :  { %v765_v57 = vadd.f32 %v761_v56, %v692_v55  ;;  %v1084_v58 = vpop.f32.mrb[7].mxu0 }
0x117d   :  { %1206 = vtanh.f32 %v765_v57  ;;  %v965_v60 = vmul.f32 -1.442695, %v765_v57 }
0x117f   :  { %1208 = vpow2.f32 %v965_v60 }
0x1187   :  { %v1207_v59 = vpop.eup %1206 }
0x1188   :  { %775 = vrot.lane.b32.xlu1 %v1207_v59, %s1349_s2 }
0x1189   :  { %v1209_v61 = vpop.eup %1208 }
0x118a   :  { %v769_v62 = vadd.f32 1.0, %v1209_v61 }
0x118c   :  { %1210 = vrcp.f32 %v769_v62 }
0x1196   :  { %v1211_v63 = vpop.eup %1210 }
0x1197   :  { %v773_v4 = vmul.f32 %v1211_v63, %v678_v50 }
0x11fa   :  { %v776_v2 = vpop.permute.xlu1 %775 }
0x11fb   :  { %v778_v3 = vmul.f32 %v1211_v63, %v776_v2 }
0x11fd   :  { %780 = vrot.lane.b32.xlu0 %v778_v3, %s1349_s2 }
0x126f   :  { %v781_v6 = vpop.permute.xlu0 %780 }
0x1270   :  { %v783_v8 = vadd.f32 %v781_v6, %v773_v4 }
0x1272   :  { %1212 = vtanh.f32 %v783_v8 }
0x127c   :  { %v1213_v9 = vpop.eup %1212 }
0x127d   :  { %786 = vrot.lane.b32.xlu1 %v1213_v9, %s1349_s2 }
0x12ef   :  { %v787_v10 = vpop.permute.xlu1 %786 }
0x12f0   :  { %v789_v11 = vmul.f32 %v1211_v63, %v787_v10 }
0x12f2   :  { %791 = vrot.lane.b32.xlu0 %v789_v11, %s1341_s7 }
0x1364   :  { %v792_v12 = vpop.permute.xlu0 %791 }
0x1365   :  { %795 = vst.msk [vmem:[#allocation7 + $0x18] sm:$0xf] %vm164_vm2, %v792_v12  ;;  %1094 = vmatmul.mubr.msk.f32.vlgmr.msra.gmra.mrb[6].mxu1 %vm57_vm1, %v792_v12 }
0x1438   :  { %v866_v14 = vpop.f32.mrb[6].mxu1 }
0x1439   :  { %v870_v15 = vadd.f32 %v866_v14, %v797_v13  ;;  %v1095_v16 = vpop.f32.mrb[7].mxu1 }
0x143b   :  { %1214 = vtanh.f32 %v870_v15  ;;  %v967_v18 = vmul.f32 -1.442695, %v870_v15 }
0x143d   :  { %1216 = vpow2.f32 %v967_v18 }
0x1445   :  { %v1215_v17 = vpop.eup %1214 }
0x1446   :  { %880 = vrot.lane.b32.xlu1 %v1215_v17, %s1349_s2 }
0x1447   :  { %v1217_v19 = vpop.eup %1216 }
0x1448   :  { %v874_v20 = vadd.f32 1.0, %v1217_v19 }
0x144a   :  { %1218 = vrcp.f32 %v874_v20 }
0x1454   :  { %v1219_v21 = vpop.eup %1218 }
0x1455   :  { %v878_v24 = vmul.f32 %v1219_v21, %v783_v8 }
0x14b8   :  { %v881_v22 = vpop.permute.xlu1 %880 }
0x14b9   :  { %v883_v23 = vmul.f32 %v1219_v21, %v881_v22 }
0x14bb   :  { %885 = vrot.lane.b32.xlu0 %v883_v23, %s1349_s2 }
0x152d   :  { %v886_v25 = vpop.permute.xlu0 %885 }
0x152e   :  { %v888_v26 = vadd.f32 %v886_v25, %v878_v24 }
0x1530   :  { %1220 = vtanh.f32 %v888_v26 }
0x153a   :  { %v1221_v27 = vpop.eup %1220 }
0x153b   :  { %891 = vrot.lane.b32.xlu1 %v1221_v27, %s1349_s2 }
0x153f   :  { %903 = vrot.lane.b32.xlu1 %v888_v26, %s1350_s3 }
0x15ad   :  { %v892_v28 = vpop.permute.xlu1 %891 }
0x15ae   :  { %v894_v29 = vmul.f32 %v1219_v21, %v892_v28 }
0x15b0   :  { %896 = vrot.lane.b32.xlu0 %v894_v29, %s1341_s7 }
0x15b1   :  { %v904_v30 = vpop.permute.xlu1 %903 }
0x15b2   :  { %906 = vst.msk [vmem:[#allocation10] sm:$0xf] %vm164_vm2, %v904_v30 }
0x1622   :  { %v897_v31 = vpop.permute.xlu0 %896 }
0x1623   :  { %900 = vst.msk [vmem:[#allocation7 + $0x1c] sm:$0xf] %vm164_vm2, %v897_v31  ;;  %901 = vst.msk [vmem:[#allocation8] sm:$0xf] %vm164_vm2, %v897_v31 }
0x1624   :  { %1277 = shalt.err (!%p1274_p6)
}
0x1625   :  { %s1278_s14 = scalar_lea.hbm %s1583_s5, 64 }
0x1626   :  { %p1279_p7 = scmp.ne.s32.totalorder %s1583_s5, %s1278_s14  ;;  %p1282_p8 = scmp.lt.u32.totalorder %s1278_s14, %s1583_s5 }
0x1628   :  { %p1284_p9 = pnand %p1282_p8, %p1279_p7 }
0x162a   :  { %1287 = shalt.err (!%p1284_p9)
}
0x162b   :  { %928 = dma.vmem_to_hbm [thread:$0]  %s926_s28, 64, %s1583_s5, [#allocation9]  }
0x162c   :  { %s1288_s0 = scalar_lea.vmem %s1523_s30, 512  ;;  %p1293_p11 = scmp.lt.s32.totalorder %s1523_s30, %s1523_s30 }
0x162d   :  { %p1289_p10 = scmp.ne.s32.totalorder %s1523_s30, %s1288_s0  ;;  %p1294_p12 = scmp.lt.s32.totalorder %s1288_s0, %s1288_s0 }
0x162f   :  { %p1295_p13 = por %p1294_p12, %p1293_p11 }
0x1631   :  { %p1296_p0 = pnand %p1295_p13, %p1289_p10 }
0x1633   :  { %1299 = shalt.err (!%p1296_p0)
}
0x1634   :  { %s1300_s23 = scalar_lea.hbm %s1582_s4, 512 }
0x1635   :  { %p1301_p1 = scmp.ne.s32.totalorder %s1582_s4, %s1300_s23  ;;  %p1304_p2 = scmp.lt.u32.totalorder %s1300_s23, %s1582_s4 }
0x1637   :  { %p1306_p3 = pnand %p1304_p2, %p1301_p1 }
0x1639   :  { %1309 = shalt.err (!%p1306_p3)
}
0x163a   :  { %918 = dma.vmem_to_hbm [thread:$0]  %s1523_s30, 512, %s1582_s4, [#allocation4], %s1341_s7, %s1341_s7, %s1342_s8  }
0x163b   :  { %s1310_s3 = scalar_lea.vmem %s1527_s10, 64  ;;  %p1315_p5 = scmp.lt.s32.totalorder %s1527_s10, %s1527_s10 }
0x163c   :  { %p1311_p4 = scmp.ne.s32.totalorder %s1527_s10, %s1310_s3  ;;  %p1316_p6 = scmp.lt.s32.totalorder %s1310_s3, %s1310_s3 }
0x163e   :  { %p1317_p7 = por %p1316_p6, %p1315_p5 }
0x1640   :  { %p1318_p8 = pnand %p1317_p7, %p1311_p4 }
0x1642   :  { %1321 = shalt.err (!%p1318_p8)
}
0x1643   :  { %s1322_s29 = scalar_lea.hbm %s1584_s6, 64 }
0x1644   :  { %p1323_p9 = scmp.ne.s32.totalorder %s1584_s6, %s1322_s29  ;;  %p1326_p10 = scmp.lt.u32.totalorder %s1322_s29, %s1584_s6 }
0x1646   :  { %p1328_p11 = pnand %p1326_p10, %p1323_p9 }
0x1648   :  { %1331 = shalt.err (!%p1328_p11)
}
0x1649   :  { %938 = dma.vmem_to_hbm [thread:$0]  %s1527_s10, 64, %s1584_s6, [#allocation9]  }
0x164a   :  { %1336 = dma.done.wait [#allocation4], 512  }
0x164b   :  { %1337 = vsyncadd [#allocation4], 4294966784 }
0x164c   :  { %1338 = dma.done.wait [#allocation9], 128  }
0x164d   :  { %1339 = vsyncadd [#allocation9], 4294967168 }
0x164e   :  { %948 = vsyncpa [#allocation3], 1 }
0x164f   :  { %949 = vsyncpa [#allocation6], 1 }
0x1650   :  { %950 = vsyncpa [#allocation4], 1 }
0x1651   :  { %951 = vsyncpa [#allocation9], 1 }

</bundles_post_ra>
